<compile_context>
chip_gen: v7x
topology: tpu7x:2x2x1
jax: 0.10.0
libtpu: 0.0.40
codegen_flags: <defaults>
</compile_context>

<pallas_src>
import math

import jax
import jax.numpy as jnp
from jax.experimental import pallas as pl
from jax.experimental.pallas import tpu as pltpu


DEFAULT_TM, DEFAULT_TN, DEFAULT_TK = 512, 512, 1024


def _round_up(x, m):
    return ((x + m - 1) // m) * m


def _vmem_cap_bytes():
    """~3/4 of per-core VMEM (48 MiB on v7x, 96 MiB on v5e/v6e); safe fallback."""
    try:
        return max(int(pltpu.get_tpu_info().vmem_capacity_bytes * 3 // 4), 16 << 20)
    except Exception:
        return 48 << 20


# ----------------------------------------------------------------------------
# Kernels
# ----------------------------------------------------------------------------
def _single_block_kernel(x_ref, w_ref, b_ref, o_ref):
    # x: (tm, K), w: (K, N), b: (1, N) -> o: (tm, N).  Full K/N in one block.
    acc = jnp.dot(x_ref[...], w_ref[...], preferred_element_type=jnp.float32)
    o_ref[...] = jnp.maximum(acc + b_ref[...], 0.0).astype(o_ref.dtype)


def _tiled_kernel_inplace(x_ref, w_ref, b_ref, o_ref):
    # f32 output: accumulate directly into the resident output block.
    k = pl.program_id(2)

    @pl.when(k == 0)
    def _():
        o_ref[...] = jnp.zeros_like(o_ref)

    # x: (tm, tk), w: (tk, tn) -- canonical MXU orientation, no transpose.
    o_ref[...] += jnp.dot(x_ref[...], w_ref[...], preferred_element_type=jnp.float32)

    @pl.when(k == pl.num_programs(2) - 1)
    def _():
        o_ref[...] = jnp.maximum(o_ref[...] + b_ref[...], 0.0)


def _tiled_kernel_scratch(x_ref, w_ref, b_ref, o_ref, acc_ref):
    # Non-f32 output: keep an f32 accumulator scratch, cast in the epilogue.
    k = pl.program_id(2)

    @pl.when(k == 0)
    def _():
        acc_ref[...] = jnp.zeros_like(acc_ref)

    acc_ref[...] += jnp.dot(x_ref[...], w_ref[...], preferred_element_type=jnp.float32)

    @pl.when(k == pl.num_programs(2) - 1)
    def _():
        o_ref[...] = jnp.maximum(acc_ref[...] + b_ref[...], 0.0).astype(o_ref.dtype)


# ----------------------------------------------------------------------------
# One-time parameter preparation (amortized "init" work, off the hot path)
# ----------------------------------------------------------------------------
def prepare_linear_relu_params(weight, bias, *, compute_dtype=jnp.bfloat16,
                               tn=DEFAULT_TN, tk=DEFAULT_TK):
    """weight: (out, in) PyTorch layout; bias: (out,).

    Returns (params, config).  The weight is transposed to (in, out),
    padded to tile multiples and cast ONCE here, so per-call work touches
    only the activation.
    """
    N, K = weight.shape
    assert bias.shape == (N,)

    small = (K <= 512) and (N <= 512) and (K * N <= 256 * 1024)
    if small:
        # Small-layer fast path: one K/N block, no padding, f32 operands
        # (launch/overhead dominated; bf16 buys nothing here).
        w_t = jnp.asarray(weight, jnp.float32).T                      # (K, N)
        b2 = jnp.asarray(bias, jnp.float32).reshape(1, N)
        return (w_t, b2), dict(small=True, N=N, K=K)

    # Tiled path.
    tn = min(tn, _round_up(N, 128))
    tk = min(tk, _round_up(K, 128))
    # v7x (2 TCs): make sure the N axis exposes >= 2 parallel blocks even when
    # M is tiny, otherwise one core idles.
    if _round_up(N, tn) // tn == 1 and tn >= 256:
        tn = _round_up(tn // 2, 128)
    Np, Kp = _round_up(N, tn), _round_up(K, tk)

    w_t = jnp.asarray(weight).T                                        # (K, N)
    if compute_dtype is not None:
        w_t = w_t.astype(compute_dtype)
    if (Kp, Np) != (K, N):
        w_t = jnp.pad(w_t, ((0, Kp - K), (0, Np - N)))
    b2 = jnp.pad(jnp.asarray(bias, jnp.float32), (0, Np - N)).reshape(1, Np)
    return (w_t, b2), dict(small=False, N=N, K=K, tn=tn, tk=tk,
                           compute_dtype=compute_dtype)


# ----------------------------------------------------------------------------
# Forward pass
# ----------------------------------------------------------------------------
def _linear_relu_small(x, w_t, b2, cfg):
    M, K = x.shape
    N = cfg["N"]
    out_dtype = x.dtype

    tm = M if M <= 512 else 512
    Mp = _round_up(M, tm)
    if Mp != M:
        x = jnp.pad(x, ((0, Mp - M), (0, 0)))

    out = pl.pallas_call(
        _single_block_kernel,
        out_shape=jax.ShapeDtypeStruct((Mp, N), out_dtype),
        grid=(Mp // tm,),
        in_specs=[
            pl.BlockSpec((tm, K), lambda i: (i, 0)),   # x tile (full K)
            pl.BlockSpec((K, N), lambda i: (0, 0)),    # whole weight, resident
            pl.BlockSpec((1, N), lambda i: (0, 0)),    # bias, resident
        ],
        out_specs=pl.BlockSpec((tm, N), lambda i: (i, 0)),
        compiler_params=pltpu.CompilerParams(dimension_semantics=("parallel",)),
        cost_estimate=pl.CostEstimate(
            flops=2 * Mp * N * K, transcendentals=0,
            bytes_accessed=(Mp * K + K * N + N + Mp * N) * 4),
    )(x, w_t, b2)
    return out[:M] if Mp != M else out


def _linear_relu_tiled(x, w_t, b2, cfg, *, tm=DEFAULT_TM):
    M, K = x.shape
    assert K == cfg["K"]
    N, tn, tk = cfg["N"], cfg["tn"], cfg["tk"]
    Kp, Np = w_t.shape
    out_dtype = x.dtype
    compute_dtype = cfg["compute_dtype"]

    # Per-call activation cast (weight was cast once at prep time).
    if compute_dtype is not None and x.dtype != compute_dtype:
        x = x.astype(compute_dtype)

    # tm rounded to the compute dtype's sublane pack (8 f32 / 16 bf16 / 32 i8).
    pack = {4: 8, 2: 16, 1: 32}.get(jnp.dtype(x.dtype).itemsize, 8)
    tm = min(tm, _round_up(M, pack))
    Mp = _round_up(M, tm)
    if (Mp, Kp) != (M, K):          # skip the pad pass entirely when aligned
        x = jnp.pad(x, ((0, Mp - M), (0, Kp - K)))

    grid = (Mp // tm, Np // tn, Kp // tk)

    use_inplace = out_dtype == jnp.float32
    kernel = _tiled_kernel_inplace if use_inplace else _tiled_kernel_scratch
    scratch = [] if use_inplace else [pltpu.VMEM((tm, tn), jnp.float32)]

    in_item = jnp.dtype(x.dtype).itemsize
    w_item = jnp.dtype(w_t.dtype).itemsize
    out_item = jnp.dtype(out_dtype).itemsize

    vmem_needed = (
        2 * tm * tk * in_item            # double-buffered x tiles
        + 2 * tk * tn * w_item           # double-buffered weight tiles
        + 2 * tm * tn * out_item         # double-buffered output tiles
        + (0 if use_inplace else tm * tn * 4)
        + 2 * tn * 4                     # bias tiles
    )
    vmem_limit = min(max(int(vmem_needed * 1.5), 8 << 20), _vmem_cap_bytes())

    cost = pl.CostEstimate(
        flops=2 * Mp * Np * Kp,
        transcendentals=0,
        bytes_accessed=(Mp * Kp * in_item + Kp * Np * w_item
                        + Np * 4 + Mp * Np * out_item),
    )

    out_padded = pl.pallas_call(
        kernel,
        out_shape=jax.ShapeDtypeStruct((Mp, Np), out_dtype),
        grid=grid,
        in_specs=[
            pl.BlockSpec((tm, tk), lambda i, j, k: (i, k)),   # x tile
            pl.BlockSpec((tk, tn), lambda i, j, k: (k, j)),   # weight tile (in, out)
            pl.BlockSpec((1, tn), lambda i, j, k: (0, j)),    # bias tile
        ],
        out_specs=pl.BlockSpec((tm, tn), lambda i, j, k: (i, j)),
        scratch_shapes=scratch,
        compiler_params=pltpu.CompilerParams(
            dimension_semantics=("parallel", "parallel", "arbitrary"),
            vmem_limit_bytes=vmem_limit,
        ),
        cost_estimate=cost,
    )(x, w_t, b2)

    return out_padded[:M, :N]


def linear_relu(x, params, config, *, tm=DEFAULT_TM):
    """y = relu(x @ W^T + b), with (params, config) from prepare_linear_relu_params."""
    w_t, b2 = params
    if config["small"]:
        return _linear_relu_small(x, w_t, b2, config)
    return _linear_relu_tiled(x, w_t, b2, config, tm=tm)


# ----------------------------------------------------------------------------
# Demo / self-test
# ----------------------------------------------------------------------------
if __name__ == "__main__":
    key = jax.random.PRNGKey(0)
    kx, kw, kb, kx2, kw2, kb2 = jax.random.split(key, 6)

    # ---- Test 1: LinearReLu(input_dim=32, output_dim=64), batch=8 ----------
    batch, input_dim, output_dim = 8, 32, 64
    bound = 1.0 / math.sqrt(input_dim)
    weight = jax.random.uniform(kw, (output_dim, input_dim), jnp.float32,
                                minval=-bound, maxval=bound)
    bias = jax.random.uniform(kb, (output_dim,), jnp.float32,
                              minval=-bound, maxval=bound)
    x = jax.random.normal(kx, (batch, input_dim), jnp.float32)

    params, cfg = prepare_linear_relu_params(weight, bias)
    out = jax.block_until_ready(linear_relu(x, params, cfg))

    ref = jnp.maximum(x @ weight.T + bias, 0.0)
    assert out.shape == (batch, output_dim)
    assert jnp.allclose(out, ref, atol=1e-5, rtol=1e-5)

    # ---- Test 2: larger layer exercising the tiled bf16 multi-K-step path --
    M2, K2, N2 = 256, 1536, 640
    bound2 = 1.0 / math.sqrt(K2)
    weight2 = jax.random.uniform(kw2, (N2, K2), jnp.float32,
                                 minval=-bound2, maxval=bound2)
    bias2 = jax.random.uniform(kb2, (N2,), jnp.float32,
                               minval=-bound2, maxval=bound2)
    x2 = jax.random.normal(kx2, (M2, K2), jnp.float32)

    params2, cfg2 = prepare_linear_relu_params(weight2, bias2,
                                               compute_dtype=jnp.bfloat16)
    out2 = jax.block_until_ready(linear_relu(x2, params2, cfg2))

    ref2 = jnp.maximum(
        jnp.dot(x2.astype(jnp.bfloat16), weight2.T.astype(jnp.bfloat16),
                preferred_element_type=jnp.float32) + bias2, 0.0)
    assert out2.shape == (M2, N2)
    assert jnp.allclose(out2, ref2, atol=1e-2, rtol=1e-2)

    print("KERNEL_OK")
</pallas_src>

<mosaic_0001>
module attributes {stable_mosaic.version = 11 : i64} {
  func.func @_single_block_kernel(%arg0: i32, %arg1: memref<8x32xf32, #tpu.memory_space<vmem>>, %arg2: memref<32x64xf32, #tpu.memory_space<vmem>>, %arg3: memref<1x64xf32, #tpu.memory_space<vmem>>, %arg4: memref<8x64xf32, #tpu.memory_space<vmem>>) attributes {dimension_semantics = [#tpu.dimension_semantics<parallel>], iteration_bounds = array<i64: 1>, scalar_prefetch = 0 : i64, scratch_operands = 0 : i64, tpu.core_type = #tpu.core_type<tc>, window_params = [{transform_indices = @transform_0, window_bounds = array<i64: 8, 32>}, {pipeline_mode = #tpu.pipeline_mode<synchronous>, transform_indices = @transform_1, window_bounds = array<i64: 32, 64>}, {pipeline_mode = #tpu.pipeline_mode<synchronous>, transform_indices = @transform_2, window_bounds = array<i64: 1, 64>}, {transform_indices = @transform_3, window_bounds = array<i64: 8, 64>}]} {
    %c0 = arith.constant 0 : index
    %c0_0 = arith.constant 0 : index
    %0 = vector.load %arg1[%c0, %c0_0] : memref<8x32xf32, #tpu.memory_space<vmem>>, vector<8x32xf32>
    %c0_1 = arith.constant 0 : index
    %c0_2 = arith.constant 0 : index
    %1 = vector.load %arg2[%c0_1, %c0_2] : memref<32x64xf32, #tpu.memory_space<vmem>>, vector<32x64xf32>
    %cst = arith.constant dense<0.000000e+00> : vector<8x64xf32>
    %2 = tpu.matmul %0, %1, %cst {dimension_numbers = #tpu.dot_dimension_numbers<[1], [0], [0], [1], [0, 0, 1, 1], [], []>} : vector<8x32xf32>, vector<32x64xf32>, vector<8x64xf32> -> vector<8x64xf32>
    %c0_3 = arith.constant 0 : index
    %c0_4 = arith.constant 0 : index
    %3 = vector.load %arg3[%c0_3, %c0_4] : memref<1x64xf32, #tpu.memory_space<vmem>>, vector<1x64xf32>
    %4 = vector.broadcast %3 : vector<1x64xf32> to vector<8x64xf32>
    %5 = arith.addf %2, %4 : vector<8x64xf32>
    %cst_5 = arith.constant 0.000000e+00 : f32
    %6 = vector.broadcast %cst_5 : f32 to vector<8x64xf32>
    %7 = arith.maximumf %5, %6 : vector<8x64xf32>
    %c0_6 = arith.constant 0 : index
    %c0_7 = arith.constant 0 : index
    %8 = vector.load %arg4[%c0_6, %c0_7] : memref<8x64xf32, #tpu.memory_space<vmem>>, vector<8x64xf32>
    tpu.vector_store %arg4[%c0_6, %c0_7], %7 {strides = array<i32>} : memref<8x64xf32, #tpu.memory_space<vmem>>, vector<8x64xf32>,
    return
  }
  func.func @transform_0(%arg0: i32) -> (i32, i32) {
    %c0_i32 = arith.constant 0 : i32
    %c0_i32_0 = arith.constant 0 : i32
    return %arg0, %c0_i32 : i32, i32
  }
  func.func @transform_1(%arg0: i32) -> (i32, i32) {
    %c0_i32 = arith.constant 0 : i32
    %c0_i32_0 = arith.constant 0 : i32
    %c0_i32_1 = arith.constant 0 : i32
    return %c0_i32, %c0_i32_0 : i32, i32
  }
  func.func @transform_2(%arg0: i32) -> (i32, i32) {
    %c0_i32 = arith.constant 0 : i32
    %c0_i32_0 = arith.constant 0 : i32
    %c0_i32_1 = arith.constant 0 : i32
    return %c0_i32, %c0_i32_0 : i32, i32
  }
  func.func @transform_3(%arg0: i32) -> (i32, i32) {
    %c0_i32 = arith.constant 0 : i32
    %c0_i32_0 = arith.constant 0 : i32
    return %arg0, %c0_i32 : i32, i32
  }
}

</mosaic_0001>

<bundles_post_ra>
// kernel: tpu_custom_call.1
= control target key start
LH: loop header
LB: loop body
LE: loop exit
PB: predicated region body
PF: predicated region fallthrough
CT: control target
= control target key end

     0   :  { %8 = vsyncpa [#allocation3], 0  ;;  %s324_s0 = inlined_call_operand.hbm [shape: f32[8,32], index: 0, kind: input, shape index: {}]   ;;  %s325_s1 = inlined_call_operand.hbm [shape: f32[32,64], index: 1, kind: input, shape index: {}]   ;;  %s326_s2 = inlined_call_operand.vmem [shape: f32[1,64], index: 2, kind: input, shape index: {}]   ;;  %s327_s3 = inlined_call_operand.hbm [shape: f32[8,64], index: 3, kind: output, shape index: {}]  }
   0x1   :  { %9 = vsyncpa [#allocation6], 0 }
   0x2   :  { %10 = vsyncpa [#allocation4], 0  ;;  %s250_s12 = smov [#allocation2]   ;;  %s251_s14 = smov [#allocation5]  }
   0x3   :  { %s17_s13 = sshll.u32 %s250_s12, 4  ;;  %s26_s15 = sshll.u32 %s251_s14, 4  ;;  %s18_s13 = int_to_ptr.vmem [resolvable:$true] %s17_s13  ;;  %s278_s15 = int_to_ptr.vmem [resolvable:$true] %s26_s15 }
   0x4   :  { %s178_s18 = scalar_lea.hbm %s324_s0, 128 }
   0x5   :  { %p179_p0 = scmp.ne.s32.totalorder %s324_s0, %s178_s18  ;;  %p182_p1 = scmp.lt.u32.totalorder %s178_s18, %s324_s0 }
   0x7   :  { %p184_p2 = pnand %p182_p1, %p179_p0 }
   0x9   :  { %187 = shalt.err (!%p184_p2)
}
   0xa   :  { %s188_s23 = scalar_lea.vmem %s18_s13, 128  ;;  %p193_p4 = scmp.lt.s32.totalorder %s18_s13, %s18_s13 }
   0xb   :  { %p189_p3 = scmp.ne.s32.totalorder %s18_s13, %s188_s23  ;;  %p194_p5 = scmp.lt.s32.totalorder %s188_s23, %s188_s23 }
   0xd   :  { %p195_p6 = por %p194_p5, %p193_p4 }
   0xf   :  { %p196_p7 = pnand %p195_p6, %p189_p3 }
  0x11   :  { %199 = shalt.err (!%p196_p7)
}
  0x12   :  { %20 = dma.hbm_to_vmem [thread:$0]  %s324_s0, 128, %s18_s13, [#allocation3]  }
  0x13   :  { %s200_s28 = scalar_lea.hbm %s325_s1, 512 }
  0x14   :  { %p201_p8 = scmp.ne.s32.totalorder %s325_s1, %s200_s28  ;;  %p204_p9 = scmp.lt.u32.totalorder %s200_s28, %s325_s1 }
  0x16   :  { %p206_p10 = pnand %p204_p9, %p201_p8 }
  0x18   :  { %209 = shalt.err (!%p206_p10)
}
  0x19   :  { %s210_s6 = scalar_lea.vmem %s278_s15, 512  ;;  %p215_p12 = scmp.lt.s32.totalorder %s278_s15, %s278_s15 }
  0x1a   :  { %p211_p11 = scmp.ne.s32.totalorder %s278_s15, %s210_s6  ;;  %p216_p13 = scmp.lt.s32.totalorder %s210_s6, %s210_s6 }
  0x1c   :  { %p217_p0 = por %p216_p13, %p215_p12 }
  0x1e   :  { %p218_p1 = pnand %p217_p0, %p211_p11 }
  0x20   :  { %221 = shalt.err (!%p218_p1)
}
  0x21   :  { %s252_s0 = smov 128   ;;  %s253_s7 = smov 8  }
  0x22   :  { %32 = dma.hbm_to_vmem [thread:$0]  %s325_s1, 512, %s278_s15, [#allocation6], %s252_s0, %s252_s0, %s253_s7  }
  0x23   :  { %244 = dma.done.wait [#allocation3], 128  }
  0x24   :  { %245 = vsyncadd [#allocation3], 4294967168 }
  0x25   :  { %246 = dma.done.wait [#allocation6], 512  }
  0x26   :  { %247 = vsyncadd [#allocation6], 4294966784  ;;  %v254_v0 = vmov 0.0|0.0   ;;  %vm255_vm0 = vmmov 0   ;;  %v256_v1 = vmov 0.0   ;;  %v42_v2 = vld [vmem:[#allocation5] sm:$0xff] }
  0x27   :  { %164 = vmatprep.subr.bf16.mxu0 %v254_v0  ;;  %161 = vmatprep.mubr.msk.f32.mxu0 %vm255_vm0, %v256_v1  ;;  %v43_v3 = vld [vmem:[#allocation5 + $0x8] sm:$0xff]  ;;  %v44_v4 = vld [vmem:[#allocation5 + $0x10] sm:$0xff]  ;;  %v45_v6 = vld [vmem:[#allocation5 + $0x18] sm:$0xff]  ;;  %vm53_vm1 = vcmask 261120   ;;  %s257_s11 = smov [#allocation7]   ;;  %vm128_vm2 = vcmask 523264  }
  0x28   :  { %v165_v5 = vpack.c.bf16 %v43_v3, %v42_v2  ;;  %v168_v7 = vpack.c.bf16 %v45_v6, %v44_v4  ;;  %v41_v8 = vld [vmem:[#allocation2] sm:$0xff]  ;;  %s136_s12 = sshll.u32 %s257_s11, 4  ;;  %s137_s12 = int_to_ptr.vmem [resolvable:$true] %s136_s12 }
  0x29   :  { %v146_v9 = vld [vmem:[%s326_s2] ss:$0 sm:$0xff]  ;;  %s222_s13 = scalar_lea.vmem %s137_s12, 128  ;;  %p227_p3 = scmp.lt.s32.totalorder %s137_s12, %s137_s12 }
  0x2a   :  { %166 = vmatpush3.bf16.msra.mxu0 %v165_v5  ;;  %p223_p2 = scmp.ne.s32.totalorder %s137_s12, %s222_s13  ;;  %p228_p4 = scmp.lt.s32.totalorder %s222_s13, %s222_s13 }
  0x2b   :  { %167 = vmatprep.subr.bf16.mxu0 %v254_v0 }
  0x2c   :  { %p229_p5 = por %p228_p4, %p227_p3 }
  0x2e   :  { %169 = vmatpush3.bf16.msra.mxu0 %v168_v7  ;;  %p230_p6 = pnand %p229_p5, %p223_p2 }
  0x31   :  { %162 = vmatmul.mubr.msk.f32.vlgmr.msra.gmra.mrb[0].mxu0 %vm53_vm1, %v41_v8 }
 0x104   :  { %v123_v10 = vpop.f32.mrb[0].mxu0 }
 0x105   :  { %v124_v11 = vadd.f32 %v146_v9, %v123_v10  ;;  %v163_v12 = vpop.f32.mrb[1].mxu0 }
 0x107   :  { %v127_v13 = vmax.f32 %v124_v11, 0.0 }
 0x109   :  { %129 = vst.msk [vmem:[#allocation7] sm:$0xff] %vm128_vm2, %v127_v13 }
 0x10a   :  { %233 = shalt.err (!%p230_p6)
}
 0x10b   :  { %s234_s2 = scalar_lea.hbm %s327_s3, 128 }
 0x10c   :  { %p235_p7 = scmp.ne.s32.totalorder %s327_s3, %s234_s2  ;;  %p238_p8 = scmp.lt.u32.totalorder %s234_s2, %s327_s3 }
 0x10e   :  { %p240_p9 = pnand %p238_p8, %p235_p7 }
 0x110   :  { %243 = shalt.err (!%p240_p9)
}
 0x111   :  { %139 = dma.vmem_to_hbm [thread:$0]  %s137_s12, 128, %s327_s3, [#allocation4]  }
 0x112   :  { %248 = dma.done.wait [#allocation4], 128  }
 0x113   :  { %249 = vsyncadd [#allocation4], 4294967168 }
 0x114   :  { %143 = vsyncpa [#allocation3], 1 }
 0x115   :  { %144 = vsyncpa [#allocation6], 1 }
 0x116   :  { %145 = vsyncpa [#allocation4], 1 }

</bundles_post_ra>
